<compile_context>
chip_gen: v7x
topology: tpu7x:2x2x1
jax: 0.10.0
libtpu: 0.0.40
codegen_flags: <defaults>
</compile_context>

<pallas_src>
import jax
import jax.numpy as jnp
from jax import lax
from jax.experimental import pallas as pl
from jax.experimental.pallas import tpu as pltpu


def _mlp_critic_kernel(obs_ref, w1_ref, b1_ref, w2_ref, b2_ref, w3_ref, b3_ref,
                       out_ref):
    # obs_ref: (tb, obs_dim)  native layout (batch on sublanes, features on lanes)
    # w*_ref : (out, in)      PyTorch Linear layout (bf16 or f32 compute dtype)
    # b*_ref : (out, 1)       float32, broadcast over lanes
    # out_ref: (1, tb)        lane-dense value slab
    x = obs_ref[...].astype(w1_ref.dtype)                       # in-kernel cast (VPU)

    # Layer 1: contract the feature axis of BOTH operands -> (h1, tb).
    # This folds the obs transpose into the MXU feed; batch lands on lanes.
    h = lax.dot_general(w1_ref[...], x,
                        dimension_numbers=(((1,), (1,)), ((), ())),
                        preferred_element_type=jnp.float32)
    h = jnp.tanh(h + b1_ref[...])                               # f32 bias + tanh

    # Layer 2: (h2, h1) @ (h1, tb) -> (h2, tb); cast the streamed operand back
    # to the compute dtype so the bf16 MXU path is kept (no-op for f32).
    h = jnp.dot(w2_ref[...], h.astype(w2_ref.dtype),
                preferred_element_type=jnp.float32)
    h = jnp.tanh(h + b2_ref[...])                               # (h2, tb) f32

    # Output layer (out_features == 1): skip the MXU — VPU multiply by the w3
    # column broadcast over lanes, then a sublane reduction (XLU), + bias.
    v = jnp.sum(w3_ref[...].astype(jnp.float32) * h, axis=0, keepdims=True)
    v = v + b3_ref[...]                                         # (1, tb)

    out_ref[...] = v.astype(out_ref.dtype)                      # lane-dense store


def _round_up(x, m):
    return ((x + m - 1) // m) * m


def _choose_tb(B, block_batch):
    """Batch tile: 128-multiple, capped by block_batch, and sized so that the
    grid has >= 2 steps when the batch allows it (v7x megacore split)."""
    cap = max(128, (block_batch // 128) * 128)
    half = _round_up(max(1, -(-B // 2)), 128)   # ceil(B/2) rounded up to 128
    return max(128, min(cap, half))


def mlp_critic_forward(obs, params, *, block_batch=8192,
                       compute_dtype=jnp.bfloat16):
    """obs: (B, obs_dim) float32.  params: PyTorch-layout Linear params
    (w_i: (out, in), b_i: (out,)).  Returns (B,) value estimates (float32)."""
    B, obs_dim = obs.shape
    w1, b1 = params["w1"], params["b1"]
    w2, b2 = params["w2"], params["b2"]
    w3, b3 = params["w3"], params["b3"]
    h1 = w1.shape[0]
    h2 = w2.shape[0]

    tb = _choose_tb(B, block_batch)
    grid = (pl.cdiv(B, tb),)

    # Weights/biases: tiny one-time casts/reshapes (no obs-sized HBM pass).
    w1c = w1.astype(compute_dtype)                              # (h1, obs_dim)
    w2c = w2.astype(compute_dtype)                              # (h2, h1)
    w3c = jnp.reshape(w3, (h2, 1)).astype(compute_dtype)        # (h2, 1) column
    b1c = jnp.reshape(b1, (h1, 1)).astype(jnp.float32)
    b2c = jnp.reshape(b2, (h2, 1)).astype(jnp.float32)
    b3c = jnp.reshape(b3, (1, 1)).astype(jnp.float32)

    out = pl.pallas_call(
        _mlp_critic_kernel,
        out_shape=jax.ShapeDtypeStruct((1, B), jnp.float32),
        grid=grid,
        in_specs=[
            # obs stream: one native-layout batch tile per grid step
            # (double-buffered by the Pallas pipeline; edge tiles are masked).
            pl.BlockSpec((tb, obs_dim), lambda i: (i, 0)),
            # weights / biases: constant block index -> DMA'd once, VMEM-resident.
            pl.BlockSpec((h1, obs_dim), lambda i: (0, 0)),
            pl.BlockSpec((h1, 1), lambda i: (0, 0)),
            pl.BlockSpec((h2, h1), lambda i: (0, 0)),
            pl.BlockSpec((h2, 1), lambda i: (0, 0)),
            pl.BlockSpec((h2, 1), lambda i: (0, 0)),
            pl.BlockSpec((1, 1), lambda i: (0, 0)),
        ],
        out_specs=pl.BlockSpec((1, tb), lambda i: (0, i)),
        compiler_params=pltpu.CompilerParams(
            dimension_semantics=("parallel",),      # megacore split on v7x
            vmem_limit_bytes=32 * 1024 * 1024,      # safe on v5e/v6e/v7x
        ),
    )(obs, w1c, b1c, w2c, b2c, w3c, b3c)

    # torch.squeeze(..., -1) equivalent.
    return out[0]


def init_params(key, obs_dim, hidden_sizes):
    """Deterministic synthetic init, PyTorch nn.Linear layout: w (out, in), b (out,)."""
    sizes = [obs_dim] + list(hidden_sizes) + [1]
    params = {}
    for i, (fan_in, fan_out) in enumerate(zip(sizes[:-1], sizes[1:]), start=1):
        key, kw, kb = jax.random.split(key, 3)
        bound = 1.0 / jnp.sqrt(float(fan_in))
        params[f"w{i}"] = jax.random.uniform(
            kw, (fan_out, fan_in), jnp.float32, -bound, bound)
        params[f"b{i}"] = jax.random.uniform(
            kb, (fan_out,), jnp.float32, -bound, bound)
    return params


def _reference_forward(obs, params):
    h = jnp.tanh(obs @ params["w1"].T + params["b1"])
    h = jnp.tanh(h @ params["w2"].T + params["b2"])
    v = h @ params["w3"].T + params["b3"]
    return jnp.squeeze(v, axis=-1)


if __name__ == "__main__":
    B, OBS_DIM = 256, 16
    HIDDEN_SIZES = (32, 32)   # Tanh activation (standard spinning-up PPO critic)

    key = jax.random.PRNGKey(0)
    key, kobs = jax.random.split(key)
    obs = jax.random.normal(kobs, (B, OBS_DIM), jnp.float32)
    params = init_params(key, OBS_DIM, HIDDEN_SIZES)
    v_ref = _reference_forward(obs, params)

    # f32 compute path (bit-faithful): tight tolerance.  block_batch small so
    # the grid has 2 tiles and exercises the pipelined batch axis.
    v_f32 = jax.block_until_ready(
        mlp_critic_forward(obs, params, block_batch=128,
                           compute_dtype=jnp.float32))
    assert v_f32.shape == (B,)
    assert jnp.allclose(v_f32, v_ref, atol=1e-4, rtol=1e-4)

    # Default bf16 MXU-operand path (f32 accumulation / bias / tanh).
    v_bf16 = jax.block_until_ready(mlp_critic_forward(obs, params))
    assert v_bf16.shape == (B,)
    assert float(jnp.max(jnp.abs(v_bf16 - v_ref))) < 0.25

    # Ragged batch (exercises block-edge masking on obs reads / out stores).
    Br = 200
    v_r = jax.block_until_ready(
        mlp_critic_forward(obs[:Br], params, block_batch=128,
                           compute_dtype=jnp.float32))
    assert v_r.shape == (Br,)
    assert jnp.allclose(v_r, v_ref[:Br], atol=1e-4, rtol=1e-4)
    assert bool(jnp.all(jnp.isfinite(v_r)))

    print("KERNEL_OK")
</pallas_src>

<mosaic_0001>
module attributes {stable_mosaic.version = 11 : i64} {
  func.func @_mlp_critic_kernel(%arg0: i32, %arg1: memref<128x16xf32, #tpu.memory_space<vmem>>, %arg2: memref<32x16xf32, #tpu.memory_space<vmem>>, %arg3: memref<32x1xf32, #tpu.memory_space<vmem>>, %arg4: memref<32x32xf32, #tpu.memory_space<vmem>>, %arg5: memref<32x1xf32, #tpu.memory_space<vmem>>, %arg6: memref<32x1xf32, #tpu.memory_space<vmem>>, %arg7: memref<1x1xf32, #tpu.memory_space<vmem>>, %arg8: memref<1x128xf32, #tpu.memory_space<vmem>>) attributes {dimension_semantics = [#tpu.dimension_semantics<parallel>], iteration_bounds = array<i64: 2>, scalar_prefetch = 0 : i64, scratch_operands = 0 : i64, tpu.core_type = #tpu.core_type<tc>, window_params = [{transform_indices = @transform_0, window_bounds = array<i64: 128, 16>}, {pipeline_mode = #tpu.pipeline_mode<synchronous>, transform_indices = @transform_1, window_bounds = array<i64: 32, 16>}, {pipeline_mode = #tpu.pipeline_mode<synchronous>, transform_indices = @transform_2, window_bounds = array<i64: 32, 1>}, {pipeline_mode = #tpu.pipeline_mode<synchronous>, transform_indices = @transform_3, window_bounds = array<i64: 32, 32>}, {pipeline_mode = #tpu.pipeline_mode<synchronous>, transform_indices = @transform_4, window_bounds = array<i64: 32, 1>}, {pipeline_mode = #tpu.pipeline_mode<synchronous>, transform_indices = @transform_5, window_bounds = array<i64: 32, 1>}, {pipeline_mode = #tpu.pipeline_mode<synchronous>, transform_indices = @transform_6, window_bounds = array<i64: 1, 1>}, {transform_indices = @transform_7, window_bounds = array<i64: 1, 128>}]} {
    %c0 = arith.constant 0 : index
    %c0_0 = arith.constant 0 : index
    %0 = vector.load %arg1[%c0, %c0_0] : memref<128x16xf32, #tpu.memory_space<vmem>>, vector<128x16xf32>
    %c0_1 = arith.constant 0 : index
    %c0_2 = arith.constant 0 : index
    %1 = vector.load %arg2[%c0_1, %c0_2] : memref<32x16xf32, #tpu.memory_space<vmem>>, vector<32x16xf32>
    %cst = arith.constant dense<0.000000e+00> : vector<32x128xf32>
    %2 = tpu.matmul %1, %0, %cst {dimension_numbers = #tpu.dot_dimension_numbers<[1], [1], [0], [0], [0, 0, 1, 0], [], []>} : vector<32x16xf32>, vector<128x16xf32>, vector<32x128xf32> -> vector<32x128xf32>
    %c0_3 = arith.constant 0 : index
    %c0_4 = arith.constant 0 : index
    %3 = vector.load %arg3[%c0_3, %c0_4] : memref<32x1xf32, #tpu.memory_space<vmem>>, vector<32x1xf32>
    %4 = vector.broadcast %3 : vector<32x1xf32> to vector<32x128xf32>
    %5 = arith.addf %2, %4 : vector<32x128xf32>
    %6 = math.tanh %5 : vector<32x128xf32>
    %c0_5 = arith.constant 0 : index
    %c0_6 = arith.constant 0 : index
    %7 = vector.load %arg4[%c0_5, %c0_6] : memref<32x32xf32, #tpu.memory_space<vmem>>, vector<32x32xf32>
    %cst_7 = arith.constant dense<0.000000e+00> : vector<32x128xf32>
    %8 = tpu.matmul %7, %6, %cst_7 {dimension_numbers = #tpu.dot_dimension_numbers<[1], [0], [0], [1], [0, 0, 1, 1], [], []>} : vector<32x32xf32>, vector<32x128xf32>, vector<32x128xf32> -> vector<32x128xf32>
    %c0_8 = arith.constant 0 : index
    %c0_9 = arith.constant 0 : index
    %9 = vector.load %arg5[%c0_8, %c0_9] : memref<32x1xf32, #tpu.memory_space<vmem>>, vector<32x1xf32>
    %10 = vector.broadcast %9 : vector<32x1xf32> to vector<32x128xf32>
    %11 = arith.addf %8, %10 : vector<32x128xf32>
    %12 = math.tanh %11 : vector<32x128xf32>
    %c0_10 = arith.constant 0 : index
    %c0_11 = arith.constant 0 : index
    %13 = vector.load %arg6[%c0_10, %c0_11] : memref<32x1xf32, #tpu.memory_space<vmem>>, vector<32x1xf32>
    %14 = vector.broadcast %13 : vector<32x1xf32> to vector<32x128xf32>
    %15 = arith.mulf %14, %12 : vector<32x128xf32>
    %cst_12 = arith.constant dense<0.000000e+00> : vector<128xf32>
    %16 = vector.multi_reduction <add>, %15, %cst_12 [0] : vector<32x128xf32> to vector<128xf32>
    %17 = vector.shape_cast %16 : vector<128xf32> to vector<1x128xf32>
    %c0_13 = arith.constant 0 : index
    %c0_14 = arith.constant 0 : index
    %18 = vector.load %arg7[%c0_13, %c0_14] : memref<1x1xf32, #tpu.memory_space<vmem>>, vector<1x1xf32>
    %19 = vector.broadcast %18 : vector<1x1xf32> to vector<1x128xf32>
    %20 = arith.addf %17, %19 : vector<1x128xf32>
    %c0_15 = arith.constant 0 : index
    %c0_16 = arith.constant 0 : index
    %21 = vector.load %arg8[%c0_15, %c0_16] : memref<1x128xf32, #tpu.memory_space<vmem>>, vector<1x128xf32>
    tpu.vector_store %arg8[%c0_15, %c0_16], %20 {strides = array<i32>} : memref<1x128xf32, #tpu.memory_space<vmem>>, vector<1x128xf32>,
    return
  }
  func.func @transform_0(%arg0: i32) -> (i32, i32) {
    %c0_i32 = arith.constant 0 : i32
    %c0_i32_0 = arith.constant 0 : i32
    return %arg0, %c0_i32 : i32, i32
  }
  func.func @transform_1(%arg0: i32) -> (i32, i32) {
    %c0_i32 = arith.constant 0 : i32
    %c0_i32_0 = arith.constant 0 : i32
    %c0_i32_1 = arith.constant 0 : i32
    return %c0_i32, %c0_i32_0 : i32, i32
  }
  func.func @transform_2(%arg0: i32) -> (i32, i32) {
    %c0_i32 = arith.constant 0 : i32
    %c0_i32_0 = arith.constant 0 : i32
    %c0_i32_1 = arith.constant 0 : i32
    return %c0_i32, %c0_i32_0 : i32, i32
  }
  func.func @transform_3(%arg0: i32) -> (i32, i32) {
    %c0_i32 = arith.constant 0 : i32
    %c0_i32_0 = arith.constant 0 : i32
    %c0_i32_1 = arith.constant 0 : i32
    return %c0_i32, %c0_i32_0 : i32, i32
  }
  func.func @transform_4(%arg0: i32) -> (i32, i32) {
    %c0_i32 = arith.constant 0 : i32
    %c0_i32_0 = arith.constant 0 : i32
    %c0_i32_1 = arith.constant 0 : i32
    return %c0_i32, %c0_i32_0 : i32, i32
  }
  func.func @transform_5(%arg0: i32) -> (i32, i32) {
    %c0_i32 = arith.constant 0 : i32
    %c0_i32_0 = arith.constant 0 : i32
    %c0_i32_1 = arith.constant 0 : i32
    return %c0_i32, %c0_i32_0 : i32, i32
  }
  func.func @transform_6(%arg0: i32) -> (i32, i32) {
    %c0_i32 = arith.constant 0 : i32
    %c0_i32_0 = arith.constant 0 : i32
    %c0_i32_1 = arith.constant 0 : i32
    return %c0_i32, %c0_i32_0 : i32, i32
  }
  func.func @transform_7(%arg0: i32) -> (i32, i32) {
    %c0_i32 = arith.constant 0 : i32
    %c0_i32_0 = arith.constant 0 : i32
    return %c0_i32, %arg0 : i32, i32
  }
}

</mosaic_0001>

<bundles_post_ra>
// kernel: tpu_custom_call.1
= control target key start
LH: loop header
LB: loop body
LE: loop exit
PB: predicated region body
PF: predicated region fallthrough
CT: control target
= control target key end

     0   :  { %s1280_s0 = inlined_call_operand.vmem [shape: f32[256,16], index: 0, kind: input, shape index: {}]   ;;  %s1281_s1 = inlined_call_operand.vmem [shape: f32[32,16], index: 1, kind: input, shape index: {}]   ;;  %s1282_s2 = inlined_call_operand.vmem [shape: f32[32,1], index: 2, kind: input, shape index: {}]   ;;  %s1283_s3 = inlined_call_operand.vmem [shape: f32[32,32], index: 3, kind: input, shape index: {}]   ;;  %s1284_s4 = inlined_call_operand.vmem [shape: f32[32,1], index: 4, kind: input, shape index: {}]   ;;  %s1285_s5 = inlined_call_operand.vmem [shape: f32[32,1], index: 5, kind: input, shape index: {}]   ;;  %s1286_s6 = inlined_call_operand.<no memory space> [shape: f32[1,1], index: 6, kind: input, shape index: {}]   ;;  %s1287_s7 = inlined_call_operand.hbm [shape: f32[1,256], index: 7, kind: output, shape index: {}]  }
   0x1   :  { %v12_v0 = vstv %s1286_s6 }
   0x2   :  { %13 = vst [vmem:[#allocation2] sm:$0x1] %v12_v0 }
   0x3   :  { %14 = vsyncpa [#allocation4], 0 }
   0x4   :  { %16 = vsyncpa [#allocation4 + $0x1], 0  ;;  %s1057_s26 = smov 0   ;;  %s1059_s27 = smov 0  }
   0x5   :  { %s1061_s28 = smov 0   ;;  %s1063_s29 = smov 0  }
   0x6 LB: > { %s720_s6 = sadd.s32 4294967295, %s1010_s29   ;;  %s721_s30 = sadd.s32 4294967294, %s1010_s29   ;;  %s1010_s29 = sphi %s1063_s29, %s1295_s29   ;;  %s1006_s28 = sphi %s1061_s28, %s1294_s28   ;;  %s1002_s27 = sphi %s1059_s27, %s1293_s27   ;;  %s998_s26 = sphi %s1057_s26, %s1292_s26  }
   0x7   : > { %s1080_s8 = sadd.s32 1, %s1010_s29   ;;  %s181_s9 = sadd.s32 1, %s1006_s28 }
   0x8   : > { %s178_s10 = ssub.s32 %s1010_s29, %s1080_s8  ;;  %p191_p0 = scmp.ne.s32.totalorder %s1006_s28, %s1002_s27 }
   0x9   : > { %p179_p1 = scmp.eq.s32.totalorder %s178_s10, 0  ;;  %p192_p2 = scmp.eq.s32.totalorder %s720_s6, 1 }
   0xa   : > { %p197_p3 = scmp.ne.s32.totalorder %s1002_s27, %s998_s26  ;;  %p198_p4 = scmp.eq.s32.totalorder %s721_s30, 1 }
   0xb   : > { %s1090_s11 = scalar_select %p179_p1, %s1006_s28, %s181_s9  }
   0xc   : > { %p1092_p5 = por %p192_p2, %p191_p0  ;;  %p1096_p6 = por %p198_p4, %p197_p3 }
   0xd   : > { %p724_p7 = scmp.ge.s32.totalorder %s1010_s29, 1  ;;  %p243_p8 = scmp.lt.s32.totalorder %s1010_s29, 3 }
   0xf   : > { %p244_p9 = pnand %p724_p7, %p243_p8 }
  0x10   : > { %s1102_s14 = sshll.u32 (!%p244_p9), %s720_s6, 4  ;;  %vm324_vm0 = vcmask (!%p244_p9), 130048   ;;  %v296_v1 = vld [vmem:[%s1281_s1] sm:$0xff] (!%p244_p9)  ;;  %v1012_v2 = vmov (!%p244_p9), 0   ;;  %v302_v4 = vld [vmem:[%s1282_s2 + $0x10] sm:$0xff] (!%p244_p9)  ;;  %v301_v5 = vld [vmem:[%s1282_s2 + $0x8] sm:$0xff] (!%p244_p9) }
  0x11   : > { %247 = sbr.rel (%p244_p9) target bundleno = 595 (0x253), region = 48  ;;  %p275_p10 = scmp.lt.s32.totalorder (!%p244_p9), %s1102_s14, 31  ;;  %814 = vmatprep.mubr.msk.f32.mxu0 (!%p244_p9), %vm324_vm0, %v296_v1  ;;  %930 = vset.pattern.permute.xlu0 (!%p244_p9), %v1012_v2  ;;  %v300_v3 = vld [vmem:[%s1282_s2] sm:$0xff] (!%p244_p9)  ;;  %v303_v6 = vld [vmem:[%s1282_s2 + $0x18] sm:$0xff] (!%p244_p9)  ;;  %vm1129_vm1 = vmpackc.low (!%p244_p9), %vm324_vm0, %vm324_vm0  ;;  %vm502_vm2 = vcmask (!%p244_p9), 261120  }
  0x12   : > { %306 = vperm.xlu0 (!%p244_p9), %930, %v300_v3   ;;  %931 = vset.pattern.permute.xlu1 (!%p244_p9), %v1012_v2  ;;  %v478_v8 = vld [vmem:[%s1284_s4] sm:$0xff] (!%p244_p9)  ;;  %v479_v14 = vld [vmem:[%s1284_s4 + $0x8] sm:$0xff] (!%p244_p9)  ;;  %v480_v16 = vld [vmem:[%s1284_s4 + $0x10] sm:$0xff] (!%p244_p9)  ;;  %s272_s16 = sand.u32 (!%p244_p9), 1, %s1002_s27   ;;  %s1013_s23 = smov (!%p244_p9), [#allocation3]  }
  0x13   : > { %316 = vperm.xlu1 (!%p244_p9), %931, %v302_v4   ;;  %v481_v17 = vld [vmem:[%s1284_s4 + $0x18] sm:$0xff] (!%p244_p9)  ;;  %v604_v20 = vld [vmem:[%s1285_s5] sm:$0xff] (!%p244_p9)  ;;  %v605_v22 = vld [vmem:[%s1285_s5 + $0x8] sm:$0xff] (!%p244_p9)  ;;  %s273_s17 = scalar_lea.vmem (!%p244_p9), [#allocation3], %s272_s16  ;;  %s952_s24 = sshll.u32 (!%p244_p9), %s1013_s23, 4  ;;  %s953_s24 = int_to_ptr.vmem [resolvable:$false] %s952_s24 }
  0x14   : > { %v606_v23 = vld [vmem:[%s1285_s5 + $0x10] sm:$0xff] (!%p244_p9)  ;;  %v607_v24 = vld [vmem:[%s1285_s5 + $0x18] sm:$0xff] (!%p244_p9)  ;;  %v641_v27 = vld [vmem:[#allocation2] sm:$0x1] (!%p244_p9)  ;;  %s666_s18 = sshll.u32 (!%p244_p9), %s273_s17, 4  ;;  %s954_s25 = scalar_lea.vmem (!%p244_p9), %s953_s24, 32  ;;  %s1240_s18 = int_to_ptr.vmem [resolvable:$true] %s666_s18 }
  0x15   : > { %v297_v41 = vld [vmem:[%s1281_s1 + $0x8] sm:$0xff] (!%p244_p9)  ;;  %v298_v42 = vld [vmem:[%s1281_s1 + $0x10] sm:$0xff] (!%p244_p9)  ;;  %v299_v43 = vld [vmem:[%s1281_s1 + $0x18] sm:$0xff] (!%p244_p9)  ;;  %s948_s22 = scalar_lea.vmem (!%p244_p9), %s1240_s18, 16  ;;  %p955_p0 = scmp.lt.s32.totalorder (!%p244_p9), %s1240_s18, %s953_s24 }
  0x16   : > { %311 = vperm.xlu0 (!%p244_p9), %930, %v301_v5   ;;  %v474_v44 = vld [vmem:[%s1283_s3] sm:$0xff] (!%p244_p9)  ;;  %v475_v63 = vld [vmem:[%s1283_s3 + $0x8] sm:$0xff] (!%p244_p9)  ;;  %v476_v0 = vld [vmem:[%s1283_s3 + $0x10] sm:$0xff] (!%p244_p9)  ;;  %p949_p11 = scmp.ne.s32.totalorder (!%p244_p9), %s1240_s18, %s948_s22  ;;  %p956_p1 = scmp.lt.s32.totalorder (!%p244_p9), %s954_s25, %s948_s22 }
  0x17   : > { %321 = vperm.xlu1 (!%p244_p9), %931, %v303_v6   ;;  %828 = vmatprep.mubr.msk.f32.mxu1 (!%p244_p9), %vm502_vm2, %v474_v44  ;;  %v477_v1 = vld [vmem:[%s1283_s3 + $0x18] sm:$0xff] (!%p244_p9) }
  0x18   : > { %s276_s21 = scalar_select %p275_p10, %s1102_s14, 31 }
  0x19   : > { %p950_p12 = pnand %p949_p11, %p1092_p5  ;;  %p957_p2 = por %p956_p1, %p955_p0 }
  0x1a   : > { %s726_s6 = sshll.u32 %s276_s21, 3  ;;  %484 = vperm.xlu0 %930, %v478_v8   ;;  %s654_s21 = scalar_lea.sflag [#allocation4], %s272_s16 }
  0x1b   : > { %s1125_s10 = scalar_lea.vmem %s1280_s0, %s726_s6  ;;  %489 = vperm.xlu1 %931, %v479_v14   ;;  %p951_p13 = pneg %p950_p12 }
  0x1c   : > { %v280_v9 = vld [vmem:[%s1125_s10] sm:$0xff]  ;;  %v281_v10 = vld [vmem:[%s1125_s10 + $0x8] sm:$0xff]  ;;  %v282_v11 = vld [vmem:[%s1125_s10 + $0x10] sm:$0xff] }
  0x1d   : > { %v834_v12 = vpack.c.bf16 %v281_v10, %v280_v9  ;;  %v283_v13 = vld [vmem:[%s1125_s10 + $0x18] sm:$0xff]  ;;  %v284_v18 = vld [vmem:[%s1125_s10 + $0x20] sm:$0xff]  ;;  %v285_v19 = vld [vmem:[%s1125_s10 + $0x28] sm:$0xff]  ;;  %p958_p3 = pnand %p957_p2, %p951_p13 }
  0x1e   : > { %v840_v15 = vpack.c.bf16 %v283_v13, %v282_v11  ;;  %494 = vperm.xlu0 %930, %v480_v16   ;;  %v846_v21 = vpack.c.bf16 %v285_v19, %v284_v18  ;;  %v286_v25 = vld [vmem:[%s1125_s10 + $0x30] sm:$0xff]  ;;  %v287_v26 = vld [vmem:[%s1125_s10 + $0x38] sm:$0xff]  ;;  %v288_v29 = vld [vmem:[%s1125_s10 + $0x40] sm:$0xff] }
  0x1f   : > { %836 = vmatprep.subr.msk.bf16.mxu0 %vm1129_vm1, %v834_v12  ;;  %499 = vperm.xlu1 %931, %v481_v17   ;;  %v852_v28 = vpack.c.bf16 %v287_v26, %v286_v25  ;;  %v289_v30 = vld [vmem:[%s1125_s10 + $0x48] sm:$0xff]  ;;  %v290_v32 = vld [vmem:[%s1125_s10 + $0x50] sm:$0xff]  ;;  %v291_v33 = vld [vmem:[%s1125_s10 + $0x58] sm:$0xff] }
  0x20   : > { %839 = vmatpush3.bf16.xpose.msk.msra.mxu0 %vm1129_vm1, %v834_v12  ;;  %v858_v31 = vpack.c.bf16 %v289_v30, %v288_v29  ;;  %v864_v34 = vpack.c.bf16 %v291_v33, %v290_v32  ;;  %v292_v35 = vld [vmem:[%s1125_s10 + $0x60] sm:$0xff]  ;;  %v293_v36 = vld [vmem:[%s1125_s10 + $0x68] sm:$0xff]  ;;  %v294_v38 = vld [vmem:[%s1125_s10 + $0x70] sm:$0xff] }
  0x21   : > { %842 = vmatprep.subr.msk.bf16.mxu0 %vm1129_vm1, %v840_v15  ;;  %v870_v37 = vpack.c.bf16 %v293_v36, %v292_v35  ;;  %v295_v39 = vld [vmem:[%s1125_s10 + $0x78] sm:$0xff]  ;;  %s1238_s10 = scalar_lea.hbm %s1287_s7, %s1102_s14 }
  0x22   : > { %610 = vperm.xlu0 %930, %v604_v20   ;;  %v876_v40 = vpack.c.bf16 %v295_v39, %v294_v38 }
  0x23   : > { %615 = vperm.xlu1 %931, %v605_v22  }
  0x26   : > { %620 = vperm.xlu0 %930, %v606_v23  }
  0x27   : > { %625 = vperm.xlu1 %931, %v607_v24  }
  0x28   : > { %845 = vmatpush3.bf16.xpose.msk.msra.mxu0 %vm1129_vm1, %v840_v15 }
  0x29   : > { %848 = vmatprep.subr.msk.bf16.mxu0 %vm1129_vm1, %v846_v21 }
  0x2a   : > { %644 = vperm.xlu0 %930, %v641_v27  }
  0x30   : > { %851 = vmatpush3.bf16.xpose.msk.msra.mxu0 %vm1129_vm1, %v846_v21 }
  0x31   : > { %854 = vmatprep.subr.msk.bf16.mxu0 %vm1129_vm1, %v852_v28 }
  0x38   : > { %857 = vmatpush3.bf16.xpose.msk.msra.mxu0 %vm1129_vm1, %v852_v28  ;;  %v647_v28 = vlaneseq }
  0x39   : > { %860 = vmatprep.subr.msk.bf16.mxu0 %vm1129_vm1, %v858_v31 }
  0x40   : > { %863 = vmatpush3.bf16.xpose.msk.msra.mxu0 %vm1129_vm1, %v858_v31  ;;  %v648_v31 = vshrl.u32 %v647_v28, 7 }
  0x41   : > { %866 = vmatprep.subr.msk.bf16.mxu0 %vm1129_vm1, %v864_v34 }
  0x48   : > { %869 = vmatpush3.bf16.xpose.msk.msra.mxu0 %vm1129_vm1, %v864_v34  ;;  %v649_v34 = vsub.s32 0, %v648_v31 }
  0x49   : > { %872 = vmatprep.subr.msk.bf16.mxu0 %vm1129_vm1, %v870_v37 }
  0x50   : > { %875 = vmatpush3.bf16.xpose.msk.msra.mxu0 %vm1129_vm1, %v870_v37 }
  0x51   : > { %878 = vmatprep.subr.msk.bf16.mxu0 %vm1129_vm1, %v876_v40 }
  0x58   : > { %881 = vmatpush3.bf16.xpose.msk.msra.mxu0 %vm1129_vm1, %v876_v40 }
  0x5f   : > { %815 = vmatmul.mubr.msk.f32.vlgmr.msra.gmra.mrb[0].mxu0 %vm324_vm0, %v297_v41 }
  0x60   : > { %817 = vmatprep.mubr.msk.f32.mxu0 %vm324_vm0, %v298_v42 }
  0x63   : > { %818 = vmatmul.mubr.msk.f32.gmra.mrb[2].mxu0 %vm324_vm0, %v299_v43 }
  0x91   : > { %v307_v45 = vpop.permute.xlu0 %306 }
  0x92   : > { %v317_v46 = vpop.permute.xlu1 %316 }
  0x95   : > { %v312_v47 = vpop.permute.xlu0 %311 }
  0x96   : > { %v322_v52 = vpop.permute.xlu1 %321 }
  0x99   : > { %v485_v3 = vpop.permute.xlu0 %484 }
  0x9a   : > { %v490_v2 = vpop.permute.xlu1 %489 }
  0x9d   : > { %v495_v10 = vpop.permute.xlu0 %494 }
  0x9e   : > { %v500_v8 = vpop.permute.xlu1 %499 }
  0xa1   : > { %v611_v14 = vpop.permute.xlu0 %610 }
  0xa2   : > { %v616_v16 = vpop.permute.xlu1 %615 }
  0xa5   : > { %v621_v23 = vpop.permute.xlu0 %620 }
  0xa6   : > { %v626_v25 = vpop.permute.xlu1 %625 }
  0xa9   : > { %v645_v36 = vpop.permute.xlu0 %644 }
  0xaa   : > { %v650_v38 = vrot.slane %v645_v36, %v649_v34 }
 0x132   : > { %v816_v48 = vpop.f32.mrb[0].mxu0 }
 0x133   : > { %v457_v49 = vadd.f32 %v816_v48, %v312_v47  ;;  %v451_v50 = vpop.f32.mrb[1].mxu0 }
 0x134   : > { %v452_v51 = vadd.f32 %v451_v50, %v307_v45 }
 0x135   : > { %932 = vtanh.f32 %v457_v49 }
 0x136   : > { %934 = vtanh.f32 %v452_v51  ;;  %v819_v53 = vpop.f32.mrb[2].mxu0 }
 0x137   : > { %v467_v54 = vadd.f32 %v819_v53, %v322_v52  ;;  %v461_v55 = vpop.f32.mrb[3].mxu0 }
 0x138   : > { %v462_v56 = vadd.f32 %v461_v55, %v317_v46 }
 0x139   : > { %936 = vtanh.f32 %v467_v54 }
 0x13a   : > { %938 = vtanh.f32 %v462_v56 }
 0x13f   : > { %v933_v57 = vpop.eup %932 }
 0x140   : > { %v935_v58 = vpop.eup %934 }
 0x141   : > { %v882_v59 = vpack.c.bf16 %v933_v57, %v935_v58 }
 0x143   : > { %v937_v60 = vpop.eup %936  ;;  %883 = vmatprep.subr.bf16.mxu1 %v882_v59 }
 0x144   : > { %v939_v61 = vpop.eup %938  ;;  %885 = vmatpush3.bf16.msra.mxu1 %v882_v59 }
 0x145   : > { %v886_v62 = vpack.c.bf16 %v937_v60, %v939_v61 }
 0x147   : > { %887 = vmatprep.subr.bf16.mxu1 %v886_v62 }
 0x148   : > { %889 = vmatpush3.bf16.msra.mxu1 %v886_v62 }
 0x14b   : > { %829 = vmatmul.mubr.msk.f32.vlgmr.msra.gmra.mrb[0].mxu1 %vm502_vm2, %v475_v63 }
 0x14c   : > { %831 = vmatprep.mubr.msk.f32.mxu1 %vm502_vm2, %v476_v0 }
 0x14f   : > { %832 = vmatmul.mubr.msk.f32.gmra.mrb[2].mxu1 %vm502_vm2, %v477_v1 }
 0x21e   : > { %v830_v4 = vpop.f32.mrb[0].mxu1 }
 0x21f   : > { %v587_v5 = vadd.f32 %v830_v4, %v490_v2  ;;  %v581_v6 = vpop.f32.mrb[1].mxu1 }
 0x220   : > { %v582_v7 = vadd.f32 %v581_v6, %v485_v3 }
 0x221   : > { %940 = vtanh.f32 %v587_v5 }
 0x222   : > { %942 = vtanh.f32 %v582_v7  ;;  %v833_v9 = vpop.f32.mrb[2].mxu1 }
 0x223   : > { %v597_v11 = vadd.f32 %v833_v9, %v500_v8  ;;  %v591_v12 = vpop.f32.mrb[3].mxu1 }
 0x224   : > { %v592_v13 = vadd.f32 %v591_v12, %v495_v10 }
 0x225   : > { %944 = vtanh.f32 %v597_v11 }
 0x226   : > { %946 = vtanh.f32 %v592_v13 }
 0x22b   : > { %v941_v15 = vpop.eup %940 }
 0x22c   : > { %v943_v17 = vpop.eup %942  ;;  %v629_v18 = vmul.f32 %v941_v15, %v616_v16 }
 0x22d   : > { %v628_v19 = vmul.f32 %v943_v17, %v611_v14 }
 0x22f   : > { %v945_v20 = vpop.eup %944  ;;  %v632_v21 = vadd.f32 %v629_v18, %v628_v19 }
 0x230   : > { %v947_v22 = vpop.eup %946  ;;  %v631_v26 = vmul.f32 %v945_v20, %v626_v25 }
 0x231   : > { %v630_v24 = vmul.f32 %v947_v22, %v621_v23 }
 0x233   : > { %v633_v27 = vadd.f32 %v632_v21, %v630_v24 }
 0x235   : > { %v634_v29 = vadd.f32 %v633_v27, %v631_v26 }
 0x237   : > { %v635_v30 = vrot.slane %v634_v29, 4 }
 0x239   : > { %v636_v32 = vadd.f32 %v635_v30, %v634_v29 }
 0x23b   : > { %v637_v33 = vrot.slane %v636_v32, 2 }
 0x23d   : > { %v638_v35 = vadd.f32 %v637_v33, %v636_v32 }
 0x23f   : > { %v639_v37 = vrot.slane %v638_v35, 1 }
 0x241   : > { %v640_v39 = vadd.f32 %v639_v37, %v638_v35 }
 0x243   : > { %v651_v40 = vadd.f32 %v650_v38, %v640_v39 }
 0x245   : > { %652 = vst [vmem:[%s273_s17] sm:$0x1] %v651_v40 }
 0x246   : > { %961 = shalt.err (!%p958_p3)
}
 0x247   : > { %s962_s14 = scalar_lea.hbm %s1238_s10, 16  ;;  %s966_s9 = scalar_lea.hbm %s1287_s7, 32 }
 0x248   : > { %p963_p4 = scmp.ne.s32.totalorder %s1238_s10, %s962_s14  ;;  %p967_p9 = scmp.lt.u32.totalorder %s1238_s10, %s1287_s7 }
 0x249   : > { %p968_p10 = scmp.lt.u32.totalorder %s966_s9, %s962_s14  ;;  %p970_p12 = scmp.lt.u32.totalorder %s962_s14, %s1238_s10 }
 0x24a   : > { %p964_p7 = pnand %p963_p4, %p1092_p5 }
 0x24b   : > { %p969_p11 = por %p968_p10, %p967_p9 }
 0x24c   : > { %p965_p8 = pneg %p964_p7 }
 0x24d   : > { %p971_p13 = por %p970_p12, %p969_p11 }
 0x24f   : > { %p972_p0 = pnand %p971_p13, %p965_p8 }
 0x251   : > { %975 = shalt.err (!%p972_p0)
}
 0x252   : > { %890 = dma.vmem_to_hbm [thread:$0]  (%p1092_p5), %s1240_s18, 16, %s1238_s10, %s654_s21  }
 0x253 PF: > { %p896_p1 = scmp.ge.s32.totalorder %s1010_s29, 2  ;;  %s678_s17 = sand.u32 1, %s998_s26  }
 0x254   : > { %s679_s19 = scalar_lea.sflag [#allocation4], %s678_s17 }
 0x255   : > { %p893_p2 = pnand %p896_p1, %p1096_p6 }
 0x257   : > { %993 = dma.done.wait (!%p893_p2), %s679_s19, 16  }
 0x258   : > { %995 = vsyncadd (!%p893_p2), %s679_s19, 4294967280  ;;  %p19_p3 = scmp.ge.s32.totalorder %s1080_s8, 4   ;;  %s1292_s26 = smov %s1002_s27 }
 0x259   : > { %s1293_s27 = smov %s1006_s28  ;;  %s1294_s28 = smov %s1090_s11 }
 0x25a   : > { %s1295_s29 = smov %s1080_s8  ;;  %21 = sbr.rel (!%p19_p3) target bundleno = 6 (0x6), region = 83 }
 0x261   :  { %683 = vsyncpa [#allocation4], 1 }
 0x262   :  { %685 = vsyncpa [#allocation4 + $0x1], 1 }

</bundles_post_ra>
